<compile_context>
chip_gen: v7x
topology: tpu7x:2x2x1
jax: 0.10.0
libtpu: 0.0.40
codegen_flags: <defaults>
</compile_context>

<pallas_src>
import functools

import jax
import jax.numpy as jnp
from jax.experimental import pallas as pl
from jax.experimental.pallas import tpu as pltpu

TEMPERATURE = 0.5
BASE_TEMPERATURE = 1.0

_NEG_BIG = -1e30  # finite "-inf" so exp()/max() never see inf - inf


def _round_up(x, m):
    return ((x + m - 1) // m) * m


def _choose_tm(B):
    if B <= 128:
        return _round_up(max(B, 8), 8)
    # Keep >= 2 anchor tiles (so the "parallel" grid axis can split across v7x's
    # two TensorCores) and minimize padding waste; ties go to the larger tile
    # (more contrast-stream reuse, fewer grid steps).
    cands = [t for t in (512, 256, 128) if B > t] or [128]
    return min(cands, key=lambda t: (_round_up(B, t) - B, -t))


def _choose_tn(N, D):
    if N <= 128:
        return _round_up(max(N, 8), 8)
    # Larger tn for small D amortizes the fixed per-grid-step overhead; cap so
    # the [tm,tn] f32 temporaries stay comfortably within v7x's 64 MiB VMEM.
    max_tn = 1024 if D <= 256 else 512
    cands = [t for t in (1024, 512, 256, 128) if t <= max_tn]
    return min(cands, key=lambda t: (_round_up(N, t) - N, -t))


def _vmem_limit_bytes():
    cap = 64 * 1024 * 1024
    try:
        cap = int(pltpu.get_tpu_info().vmem_capacity_bytes)
    except Exception:
        pass
    # ~16 MiB headroom for compiler scratch; 128 MiB parts -> 112 MiB, v7x -> 48 MiB.
    return max(32 * 1024 * 1024, cap - 16 * 1024 * 1024)


def _supcon_kernel(alab_ref, clab_ref, a_ref, c_ref, out_ref,
                   m_sc, z_sc, sms_sc, sm_sc, a_sc,
                   *, n_cols, n_views, inv_t, has_col_padding):
    # Refs per grid step (m, n):
    #   alab_ref : [tm, 1] int32  anchor labels (-1 on padded rows)
    #   clab_ref : [1, tn] int32  contrast labels (-2 on padded cols)
    #   a_ref    : [tm, D]        anchor tile   (features[:, 0])
    #   c_ref    : [tn, D]        contrast tile (features reshaped [B*n_views, D])
    #   out_ref  : [tm, 1] f32    per-anchor mean_log_prob_pos (written on last n)
    #   scratch  : running max / exp-sum / sum(mask*s) / sum(mask)  [tm,1] f32
    #              a_sc: [tm, D] anchor tile pre-scaled by 1/T (written at n==0)
    n_idx = pl.program_id(1)
    tm = a_ref.shape[0]
    tn = c_ref.shape[0]

    @pl.when(n_idx == 0)
    def _init():
        m_sc[...] = jnp.full_like(m_sc, _NEG_BIG)
        z_sc[...] = jnp.zeros_like(z_sc)
        sms_sc[...] = jnp.zeros_like(sms_sc)
        sm_sc[...] = jnp.zeros_like(sm_sc)
        # Hoisted: the anchor tile is constant across n (index_map (m, 0)), so
        # the 1/temperature rescale runs once per anchor tile, not per grid step.
        # (T=0.5 is exact in bf16; for non-power-of-two T with bf16 features,
        # bit-closeness to the f32 reference may degrade slightly.)
        av = a_ref[...]
        a_sc[...] = av * jnp.asarray(inv_t, dtype=av.dtype)

    # s[i, j] = <a_i, c_j> / T -- contract dim 1 of BOTH operands so Mosaic
    # feeds the MXU the [tn, D] tile directly (no in-kernel transpose).
    s = jax.lax.dot_general(
        a_sc[...], c_ref[...],
        dimension_numbers=(((1,), (1,)), ((), ())),
        preferred_element_type=jnp.float32,
    )

    # Masks from small iota vectors + broadcast compares (no [tm,tn] iotas, no
    # full-tile multiply): col == row * n_views is the anchor's own view-0 copy.
    row_ids = pl.program_id(0) * tm + jax.lax.broadcasted_iota(jnp.int32, (tm, 1), 0)
    col_ids = n_idx * tn + jax.lax.broadcasted_iota(jnp.int32, (1, tn), 1)
    not_self = col_ids != row_ids * n_views                       # broadcast -> [tm, tn]
    # Positive mask: same label, excluding self.  Padded rows/cols use -1/-2
    # sentinels, so they can never match -- no `valid` term needed here.
    pos = jnp.logical_and(alab_ref[...] == clab_ref[...], not_self)
    pos_f = pos.astype(jnp.float32)

    if has_col_padding:
        valid = col_ids < n_cols                                  # [1, tn]
        s_v = jnp.where(valid, s, _NEG_BIG)                       # kill padded cols
    else:
        s_v = s                                                   # no extra select

    # Online (flash-style) softmax statistics over the contrast axis.
    tile_max = jnp.max(s_v, axis=1, keepdims=True)                # max includes self (ref semantics)
    m_prev = m_sc[...]
    m_new = jnp.maximum(m_prev, tile_max)
    z_corr = jnp.exp(m_prev - m_new)
    p = jnp.exp(jnp.where(not_self, s_v, _NEG_BIG) - m_new)       # masked entries -> exactly 0
    z_sc[...] = z_sc[...] * z_corr + jnp.sum(p, axis=1, keepdims=True)
    # Fused log-prob pieces (no log_prob / mask*log_prob temporaries):
    sms_sc[...] += jnp.sum(pos_f * s, axis=1, keepdims=True)
    sm_sc[...] += jnp.sum(pos_f, axis=1, keepdims=True)
    m_sc[...] = m_new

    @pl.when(n_idx == pl.num_programs(1) - 1)
    def _finalize():
        sm = sm_sc[...]
        # sum(mask*log_prob) = sum(mask*s) - (max + log(Z + eps)) * sum(mask)
        log_z = jnp.log(z_sc[...] + 1e-6)
        num = sms_sc[...] - (m_sc[...] + log_z) * sm
        out_ref[...] = (num * pl.reciprocal(sm + 1e-6, approx=False)).astype(out_ref.dtype)


def supcon_loss(features, labels=None, mask=None, *,
                temperature=TEMPERATURE, base_temperature=BASE_TEMPERATURE,
                matmul_dtype=None):
    """SupConLoss forward (contrast_mode='one').  features: [bsz, n_views, ...]."""
    if features.ndim < 3:
        raise ValueError("`features` needs to be [bsz, n_views, ...], "
                         "at least 3 dimensions are required")
    if features.ndim > 3:
        features = features.reshape(features.shape[0], features.shape[1], -1)
    B, n_views, D = features.shape

    if labels is not None and mask is not None:
        raise ValueError("Cannot define both `labels` and `mask`")
    if mask is not None:
        # TODO(synk): arbitrary user-supplied [bsz, bsz] masks need a blocked int8
        # mask-input path; only labels / SimCLR(eye) masks are built in-kernel.
        raise NotImplementedError("explicit `mask` argument not supported by the "
                                  "Pallas kernel (use `labels` or neither)")
    if labels is None:
        lab = jnp.arange(B, dtype=jnp.int32)            # SimCLR: mask = eye(B)
    else:
        lab = jnp.asarray(labels, dtype=jnp.int32).reshape(-1)
        if lab.shape[0] != B:
            raise ValueError("Num of labels does not match num of features")

    N = B * n_views

    # Padding-aware, megacore-friendly tile selection (blocks obey the (8,128) /
    # full-dim TPU tiling rule: tm, tn are multiples of 8/128 or full extents).
    tm = _choose_tm(B)
    tn = _choose_tn(N, D)
    if D > 1024:                                         # keep huge-D tiles in VMEM
        tm, tn = min(tm, 256), min(tn, 256)
    B_pad = _round_up(B, tm)
    N_pad = _round_up(N, tn)

    # anchor = features[:, 0]; contrast = free reshape (row i*n_views + v) -- no
    # transpose/cat HBM copy of the whole feature tensor.
    anchor = features[:, 0, :]
    contrast = features.reshape(N, D)
    if matmul_dtype is not None:                         # optional bf16 MXU path
        anchor = anchor.astype(matmul_dtype)
        contrast = contrast.astype(matmul_dtype)
    if B_pad != B:
        anchor = jnp.pad(anchor, ((0, B_pad - B), (0, 0)))
    if N_pad != N:
        contrast = jnp.pad(contrast, ((0, N_pad - N), (0, 0)))

    # Tiny int32 label vectors replace any [B, N] f32 masks.
    a_lab = jnp.full((B_pad, 1), -1, dtype=jnp.int32).at[:B, 0].set(lab)
    c_lab = jnp.full((1, N_pad), -2, dtype=jnp.int32).at[0, :N].set(
        jnp.repeat(lab, n_views))

    grid = (B_pad // tm, N_pad // tn)
    kernel = functools.partial(
        _supcon_kernel, n_cols=N, n_views=n_views, inv_t=1.0 / temperature,
        has_col_padding=(N_pad != N))

    mlpp = pl.pallas_call(
        kernel,
        out_shape=jax.ShapeDtypeStruct((B_pad, 1), jnp.float32),
        grid_spec=pltpu.PrefetchScalarGridSpec(
            num_scalar_prefetch=0,
            grid=grid,
            in_specs=[
                pl.BlockSpec((tm, 1), lambda m, n: (m, 0)),   # anchor labels
                pl.BlockSpec((1, tn), lambda m, n: (0, n)),   # contrast labels
                pl.BlockSpec((tm, D), lambda m, n: (m, 0)),   # anchor features
                # TODO(synk): on v5e consider pipeline_mode=pl.Buffered(3) here to
                # hide the contrast-stream DMA behind compute.
                pl.BlockSpec((tn, D), lambda m, n: (n, 0)),   # contrast features
            ],
            out_specs=pl.BlockSpec((tm, 1), lambda m, n: (m, 0)),
            scratch_shapes=[pltpu.VMEM((tm, 1), jnp.float32)] * 4
                           + [pltpu.VMEM((tm, D), anchor.dtype)],
        ),
        compiler_params=pltpu.CompilerParams(
            dimension_semantics=("parallel", "arbitrary"),
            vmem_limit_bytes=_vmem_limit_bytes(),
        ),
    )(a_lab, c_lab, anchor, contrast)

    # Final tiny reduction in plain JAX (keeps the anchor grid axis "parallel").
    return -(temperature / base_temperature) * jnp.mean(mlpp[:B, 0])


def _reference_supcon_loss(features, labels=None,
                           temperature=TEMPERATURE, base_temperature=BASE_TEMPERATURE):
    """Pure-JAX transcription of the torch module (contrast_mode='one')."""
    B, n_views, D = features.shape
    if labels is None:
        base_mask = jnp.eye(B, dtype=jnp.float32)
    else:
        lab = labels.reshape(-1, 1)
        base_mask = (lab == lab.T).astype(jnp.float32)
    contrast_feature = jnp.transpose(features, (1, 0, 2)).reshape(n_views * B, D)
    anchor_feature = features[:, 0]
    adc = (anchor_feature @ contrast_feature.T) / temperature
    logits = adc - jnp.max(adc, axis=1, keepdims=True)
    mask_rep = jnp.tile(base_mask, (1, n_views))
    row = jnp.arange(B)[:, None]
    col = jnp.arange(n_views * B)[None, :]
    logits_mask = jnp.where(col == row, 0.0, 1.0)
    mask_rep = mask_rep * logits_mask
    exp_logits = jnp.exp(logits) * logits_mask
    log_prob = logits - jnp.log(exp_logits.sum(1, keepdims=True) + 1e-6)
    mlpp = (mask_rep * log_prob).sum(1) / (mask_rep.sum(1) + 1e-6)
    return jnp.mean(-(temperature / base_temperature) * mlpp)


if __name__ == "__main__":
    key = jax.random.PRNGKey(0)
    B, n_views, D = 8, 2, 32
    features = jax.random.normal(key, (B, n_views, D), dtype=jnp.float32)

    # Unsupervised (SimCLR) case.
    loss = jax.block_until_ready(supcon_loss(features))
    ref = jax.block_until_ready(_reference_supcon_loss(features))
    assert jnp.allclose(loss, ref, atol=1e-3, rtol=1e-3), (loss, ref)

    # Supervised (labels) case.
    labels = jnp.array([0, 1, 2, 3, 0, 1, 2, 3], dtype=jnp.int32)
    loss_l = jax.block_until_ready(supcon_loss(features, labels=labels))
    ref_l = jax.block_until_ready(_reference_supcon_loss(features, labels=labels))
    assert jnp.allclose(loss_l, ref_l, atol=1e-3, rtol=1e-3), (loss_l, ref_l)

    # Awkward shape (exercises row + column padding paths).
    feats2 = jax.random.normal(jax.random.PRNGKey(1), (6, 3, 24), dtype=jnp.float32)
    loss_p = jax.block_until_ready(supcon_loss(feats2))
    ref_p = jax.block_until_ready(_reference_supcon_loss(feats2))
    assert jnp.allclose(loss_p, ref_p, atol=1e-3, rtol=1e-3), (loss_p, ref_p)

    print("KERNEL_OK")
</pallas_src>

<mosaic_0001>
module attributes {stable_mosaic.version = 11 : i64} {
  func.func @_supcon_kernel(%arg0: i32, %arg1: i32, %arg2: memref<8x1xi32, #tpu.memory_space<vmem>>, %arg3: memref<1x16xi32, #tpu.memory_space<vmem>>, %arg4: memref<8x32xf32, #tpu.memory_space<vmem>>, %arg5: memref<16x32xf32, #tpu.memory_space<vmem>>, %arg6: memref<8x1xf32, #tpu.memory_space<vmem>>, %arg7: memref<8x1xf32, #tpu.memory_space<vmem>>, %arg8: memref<8x1xf32, #tpu.memory_space<vmem>>, %arg9: memref<8x1xf32, #tpu.memory_space<vmem>>, %arg10: memref<8x1xf32, #tpu.memory_space<vmem>>, %arg11: memref<8x32xf32, #tpu.memory_space<vmem>>) attributes {dimension_semantics = [#tpu.dimension_semantics<parallel>, #tpu.dimension_semantics<arbitrary>], iteration_bounds = array<i64: 1, 1>, scalar_prefetch = 0 : i64, scratch_operands = 5 : i64, tpu.core_type = #tpu.core_type<tc>, window_params = [{transform_indices = @transform_0, window_bounds = array<i64: 8, 1>}, {transform_indices = @transform_1, window_bounds = array<i64: 1, 16>}, {transform_indices = @transform_2, window_bounds = array<i64: 8, 32>}, {transform_indices = @transform_3, window_bounds = array<i64: 16, 32>}, {transform_indices = @transform_4, window_bounds = array<i64: 8, 1>}]} {
    %c0_i32 = arith.constant 0 : i32
    %0 = arith.cmpi eq, %arg1, %c0_i32 : i32
    %1 = arith.extui %0 : i1 to i32
    %c0_i32_0 = arith.constant 0 : i32
    %2 = arith.cmpi ne, %1, %c0_i32_0 : i32
    scf.if %2 {
      %cst_31 = arith.constant -1.000000e+30 : f32
      %59 = vector.broadcast %cst_31 : f32 to vector<8x1xf32>
      %c0_32 = arith.constant 0 : index
      %c0_33 = arith.constant 0 : index
      %60 = vector.load %arg7[%c0_32, %c0_33] : memref<8x1xf32, #tpu.memory_space<vmem>>, vector<8x1xf32>
      tpu.vector_store %arg7[%c0_32, %c0_33], %59 {strides = array<i32>} : memref<8x1xf32, #tpu.memory_space<vmem>>, vector<8x1xf32>,
      %cst_34 = arith.constant 0.000000e+00 : f32
      %61 = vector.broadcast %cst_34 : f32 to vector<8x1xf32>
      %c0_35 = arith.constant 0 : index
      %c0_36 = arith.constant 0 : index
      %62 = vector.load %arg8[%c0_35, %c0_36] : memref<8x1xf32, #tpu.memory_space<vmem>>, vector<8x1xf32>
      tpu.vector_store %arg8[%c0_35, %c0_36], %61 {strides = array<i32>} : memref<8x1xf32, #tpu.memory_space<vmem>>, vector<8x1xf32>,
      %cst_37 = arith.constant 0.000000e+00 : f32
      %63 = vector.broadcast %cst_37 : f32 to vector<8x1xf32>
      %c0_38 = arith.constant 0 : index
      %c0_39 = arith.constant 0 : index
      %64 = vector.load %arg9[%c0_38, %c0_39] : memref<8x1xf32, #tpu.memory_space<vmem>>, vector<8x1xf32>
      tpu.vector_store %arg9[%c0_38, %c0_39], %63 {strides = array<i32>} : memref<8x1xf32, #tpu.memory_space<vmem>>, vector<8x1xf32>,
      %cst_40 = arith.constant 0.000000e+00 : f32
      %65 = vector.broadcast %cst_40 : f32 to vector<8x1xf32>
      %c0_41 = arith.constant 0 : index
      %c0_42 = arith.constant 0 : index
      %66 = vector.load %arg10[%c0_41, %c0_42] : memref<8x1xf32, #tpu.memory_space<vmem>>, vector<8x1xf32>
      tpu.vector_store %arg10[%c0_41, %c0_42], %65 {strides = array<i32>} : memref<8x1xf32, #tpu.memory_space<vmem>>, vector<8x1xf32>,
      %c0_43 = arith.constant 0 : index
      %c0_44 = arith.constant 0 : index
      %67 = vector.load %arg4[%c0_43, %c0_44] : memref<8x32xf32, #tpu.memory_space<vmem>>, vector<8x32xf32>
      %cst_45 = arith.constant 2.000000e+00 : f32
      %68 = vector.broadcast %cst_45 : f32 to vector<8x32xf32>
      %69 = arith.mulf %67, %68 : vector<8x32xf32>
      %c0_46 = arith.constant 0 : index
      %c0_47 = arith.constant 0 : index
      %70 = vector.load %arg11[%c0_46, %c0_47] : memref<8x32xf32, #tpu.memory_space<vmem>>, vector<8x32xf32>
      tpu.vector_store %arg11[%c0_46, %c0_47], %69 {strides = array<i32>} : memref<8x32xf32, #tpu.memory_space<vmem>>, vector<8x32xf32>,
    } else {
    }
    %c0 = arith.constant 0 : index
    %c0_1 = arith.constant 0 : index
    %3 = vector.load %arg11[%c0, %c0_1] : memref<8x32xf32, #tpu.memory_space<vmem>>, vector<8x32xf32>
    %c0_2 = arith.constant 0 : index
    %c0_3 = arith.constant 0 : index
    %4 = vector.load %arg5[%c0_2, %c0_3] : memref<16x32xf32, #tpu.memory_space<vmem>>, vector<16x32xf32>
    %cst = arith.constant dense<0.000000e+00> : vector<8x16xf32>
    %5 = tpu.matmul %3, %4, %cst {dimension_numbers = #tpu.dot_dimension_numbers<[1], [1], [0], [0], [0, 0, 1, 0], [], []>} : vector<8x32xf32>, vector<16x32xf32>, vector<8x16xf32> -> vector<8x16xf32>
    %c8_i32 = arith.constant 8 : i32
    %6 = arith.muli %arg0, %c8_i32 : i32
    %7 = tpu.iota {dimensions = array<i32: 0>} : vector<8x1xi32>
    %8 = vector.broadcast %6 : i32 to vector<8x1xi32>
    %9 = arith.addi %8, %7 : vector<8x1xi32>
    %c16_i32 = arith.constant 16 : i32
    %10 = arith.muli %arg1, %c16_i32 : i32
    %11 = tpu.iota {dimensions = array<i32: 1>} : vector<1x16xi32>
    %12 = vector.broadcast %10 : i32 to vector<1x16xi32>
    %13 = arith.addi %12, %11 : vector<1x16xi32>
    %c2_i32 = arith.constant 2 : i32
    %14 = vector.broadcast %c2_i32 : i32 to vector<8x1xi32>
    %15 = arith.muli %9, %14 : vector<8x1xi32>
    %16 = vector.broadcast %13 : vector<1x16xi32> to vector<8x16xi32>
    %17 = vector.broadcast %15 : vector<8x1xi32> to vector<8x16xi32>
    %18 = arith.cmpi ne, %16, %17 : vector<8x16xi32>
    %c0_4 = arith.constant 0 : index
    %c0_5 = arith.constant 0 : index
    %19 = vector.load %arg2[%c0_4, %c0_5] : memref<8x1xi32, #tpu.memory_space<vmem>>, vector<8x1xi32>
    %c0_6 = arith.constant 0 : index
    %c0_7 = arith.constant 0 : index
    %20 = vector.load %arg3[%c0_6, %c0_7] : memref<1x16xi32, #tpu.memory_space<vmem>>, vector<1x16xi32>
    %21 = vector.broadcast %19 : vector<8x1xi32> to vector<8x16xi32>
    %22 = vector.broadcast %20 : vector<1x16xi32> to vector<8x16xi32>
    %23 = arith.cmpi eq, %21, %22 : vector<8x16xi32>
    %24 = arith.andi %23, %18 : vector<8x16xi1>
    %25 = arith.extui %24 : vector<8x16xi1> to vector<8x16xi32>
    %26 = arith.sitofp %25 : vector<8x16xi32> to vector<8x16xf32>
    %cst_8 = arith.constant dense<0xFF800000> : vector<8xf32>
    %27 = vector.multi_reduction <maximumf>, %5, %cst_8 [1] : vector<8x16xf32> to vector<8xf32>
    %28 = vector.shape_cast %27 : vector<8xf32> to vector<8x1xf32>
    %c0_9 = arith.constant 0 : index
    %c0_10 = arith.constant 0 : index
    %29 = vector.load %arg7[%c0_9, %c0_10] : memref<8x1xf32, #tpu.memory_space<vmem>>, vector<8x1xf32>
    %30 = arith.maximumf %29, %28 : vector<8x1xf32>
    %31 = arith.subf %29, %30 : vector<8x1xf32>
    %32 = math.exp %31 : vector<8x1xf32>
    %cst_11 = arith.constant -1.000000e+30 : f32
    %33 = vector.broadcast %cst_11 : f32 to vector<8x16xf32>
    %34 = arith.select %18, %5, %33 : vector<8x16xi1>, vector<8x16xf32>
    %35 = vector.broadcast %30 : vector<8x1xf32> to vector<8x16xf32>
    %36 = arith.subf %34, %35 : vector<8x16xf32>
    %37 = math.exp %36 : vector<8x16xf32>
    %c0_12 = arith.constant 0 : index
    %c0_13 = arith.constant 0 : index
    %38 = vector.load %arg8[%c0_12, %c0_13] : memref<8x1xf32, #tpu.memory_space<vmem>>, vector<8x1xf32>
    %39 = arith.mulf %38, %32 : vector<8x1xf32>
    %cst_14 = arith.constant dense<0.000000e+00> : vector<8xf32>
    %40 = vector.multi_reduction <add>, %37, %cst_14 [1] : vector<8x16xf32> to vector<8xf32>
    %41 = vector.shape_cast %40 : vector<8xf32> to vector<8x1xf32>
    %42 = arith.addf %39, %41 : vector<8x1xf32>
    %c0_15 = arith.constant 0 : index
    %c0_16 = arith.constant 0 : index
    %43 = vector.load %arg8[%c0_15, %c0_16] : memref<8x1xf32, #tpu.memory_space<vmem>>, vector<8x1xf32>
    tpu.vector_store %arg8[%c0_15, %c0_16], %42 {strides = array<i32>} : memref<8x1xf32, #tpu.memory_space<vmem>>, vector<8x1xf32>,
    %c0_17 = arith.constant 0 : index
    %c0_18 = arith.constant 0 : index
    %44 = vector.load %arg9[%c0_17, %c0_18] : memref<8x1xf32, #tpu.memory_space<vmem>>, vector<8x1xf32>
    %45 = arith.mulf %26, %5 : vector<8x16xf32>
    %cst_19 = arith.constant dense<0.000000e+00> : vector<8xf32>
    %46 = vector.multi_reduction <add>, %45, %cst_19 [1] : vector<8x16xf32> to vector<8xf32>
    %47 = vector.shape_cast %46 : vector<8xf32> to vector<8x1xf32>
    %48 = arith.addf %44, %47 : vector<8x1xf32>
    %c0_20 = arith.constant 0 : index
    %c0_21 = arith.constant 0 : index
    %49 = vector.load %arg9[%c0_20, %c0_21] : memref<8x1xf32, #tpu.memory_space<vmem>>, vector<8x1xf32>
    tpu.vector_store %arg9[%c0_20, %c0_21], %48 {strides = array<i32>} : memref<8x1xf32, #tpu.memory_space<vmem>>, vector<8x1xf32>,
    %c0_22 = arith.constant 0 : index
    %c0_23 = arith.constant 0 : index
    %50 = vector.load %arg10[%c0_22, %c0_23] : memref<8x1xf32, #tpu.memory_space<vmem>>, vector<8x1xf32>
    %cst_24 = arith.constant dense<0.000000e+00> : vector<8xf32>
    %51 = vector.multi_reduction <add>, %26, %cst_24 [1] : vector<8x16xf32> to vector<8xf32>
    %52 = vector.shape_cast %51 : vector<8xf32> to vector<8x1xf32>
    %53 = arith.addf %50, %52 : vector<8x1xf32>
    %c0_25 = arith.constant 0 : index
    %c0_26 = arith.constant 0 : index
    %54 = vector.load %arg10[%c0_25, %c0_26] : memref<8x1xf32, #tpu.memory_space<vmem>>, vector<8x1xf32>
    tpu.vector_store %arg10[%c0_25, %c0_26], %53 {strides = array<i32>} : memref<8x1xf32, #tpu.memory_space<vmem>>, vector<8x1xf32>,
    %c0_27 = arith.constant 0 : index
    %c0_28 = arith.constant 0 : index
    %55 = vector.load %arg7[%c0_27, %c0_28] : memref<8x1xf32, #tpu.memory_space<vmem>>, vector<8x1xf32>
    tpu.vector_store %arg7[%c0_27, %c0_28], %30 {strides = array<i32>} : memref<8x1xf32, #tpu.memory_space<vmem>>, vector<8x1xf32>,
    %c0_i32_29 = arith.constant 0 : i32
    %56 = arith.cmpi eq, %arg1, %c0_i32_29 : i32
    %57 = arith.extui %56 : i1 to i32
    %c0_i32_30 = arith.constant 0 : i32
    %58 = arith.cmpi ne, %57, %c0_i32_30 : i32
    scf.if %58 {
      %c0_31 = arith.constant 0 : index
      %c0_32 = arith.constant 0 : index
      %59 = vector.load %arg10[%c0_31, %c0_32] : memref<8x1xf32, #tpu.memory_space<vmem>>, vector<8x1xf32>
      %c0_33 = arith.constant 0 : index
      %c0_34 = arith.constant 0 : index
      %60 = vector.load %arg8[%c0_33, %c0_34] : memref<8x1xf32, #tpu.memory_space<vmem>>, vector<8x1xf32>
      %cst_35 = arith.constant 9.99999997E-7 : f32
      %61 = vector.broadcast %cst_35 : f32 to vector<8x1xf32>
      %62 = arith.addf %60, %61 : vector<8x1xf32>
      %63 = math.log %62 : vector<8x1xf32>
      %c0_36 = arith.constant 0 : index
      %c0_37 = arith.constant 0 : index
      %64 = vector.load %arg9[%c0_36, %c0_37] : memref<8x1xf32, #tpu.memory_space<vmem>>, vector<8x1xf32>
      %c0_38 = arith.constant 0 : index
      %c0_39 = arith.constant 0 : index
      %65 = vector.load %arg7[%c0_38, %c0_39] : memref<8x1xf32, #tpu.memory_space<vmem>>, vector<8x1xf32>
      %66 = arith.addf %65, %63 : vector<8x1xf32>
      %67 = arith.mulf %66, %59 : vector<8x1xf32>
      %68 = arith.subf %64, %67 : vector<8x1xf32>
      %cst_40 = arith.constant 9.99999997E-7 : f32
      %69 = vector.broadcast %cst_40 : f32 to vector<8x1xf32>
      %70 = arith.addf %59, %69 : vector<8x1xf32>
      %71 = tpu.reciprocal %70 : vector<8x1xf32> -> vector<8x1xf32>
      %72 = arith.mulf %68, %71 : vector<8x1xf32>
      %c0_41 = arith.constant 0 : index
      %c0_42 = arith.constant 0 : index
      %73 = vector.load %arg6[%c0_41, %c0_42] : memref<8x1xf32, #tpu.memory_space<vmem>>, vector<8x1xf32>
      tpu.vector_store %arg6[%c0_41, %c0_42], %72 {strides = array<i32>} : memref<8x1xf32, #tpu.memory_space<vmem>>, vector<8x1xf32>,
    } else {
    }
    return
  }
  func.func @transform_0(%arg0: i32, %arg1: i32) -> (i32, i32) {
    %c0_i32 = arith.constant 0 : i32
    %c0_i32_0 = arith.constant 0 : i32
    return %arg0, %c0_i32 : i32, i32
  }
  func.func @transform_1(%arg0: i32, %arg1: i32) -> (i32, i32) {
    %c0_i32 = arith.constant 0 : i32
    %c0_i32_0 = arith.constant 0 : i32
    return %c0_i32, %arg1 : i32, i32
  }
  func.func @transform_2(%arg0: i32, %arg1: i32) -> (i32, i32) {
    %c0_i32 = arith.constant 0 : i32
    %c0_i32_0 = arith.constant 0 : i32
    return %arg0, %c0_i32 : i32, i32
  }
  func.func @transform_3(%arg0: i32, %arg1: i32) -> (i32, i32) {
    %c0_i32 = arith.constant 0 : i32
    %c0_i32_0 = arith.constant 0 : i32
    return %arg1, %c0_i32 : i32, i32
  }
  func.func @transform_4(%arg0: i32, %arg1: i32) -> (i32, i32) {
    %c0_i32 = arith.constant 0 : i32
    %c0_i32_0 = arith.constant 0 : i32
    return %arg0, %c0_i32 : i32, i32
  }
}

</mosaic_0001>

<bundles_post_ra>
// kernel: tpu_custom_call.1
= control target key start
LH: loop header
LB: loop body
LE: loop exit
PB: predicated region body
PF: predicated region fallthrough
CT: control target
= control target key end

     0   :  { %9 = vsyncpa [#allocation8], 0  ;;  %s271_s15 = smov [#allocation7]   ;;  %s342_s0 = inlined_call_operand.vmem [shape: s32[8,1], index: 0, kind: input, shape index: {}]   ;;  %s343_s1 = inlined_call_operand.vmem [shape: s32[1,16], index: 1, kind: input, shape index: {}]   ;;  %s344_s2 = inlined_call_operand.hbm [shape: f32[8,32], index: 2, kind: input, shape index: {}]   ;;  %s345_s3 = inlined_call_operand.vmem [shape: f32[16,32], index: 3, kind: input, shape index: {}]   ;;  %s346_s4 = inlined_call_operand.vmem [shape: f32[8,1], index: 4, kind: output, shape index: {}]  }
   0x1   :  { %s20_s16 = sshll.u32 %s271_s15, 4  ;;  %s247_s19 = scalar_lea.hbm %s344_s2, 128  ;;  %s21_s16 = int_to_ptr.vmem [resolvable:$true] %s20_s16 }
   0x2   :  { %p248_p0 = scmp.ne.s32.totalorder %s344_s2, %s247_s19  ;;  %p251_p1 = scmp.lt.u32.totalorder %s247_s19, %s344_s2 }
   0x4   :  { %p253_p2 = pnand %p251_p1, %p248_p0 }
   0x6   :  { %256 = shalt.err (!%p253_p2)
}
   0x7   :  { %s257_s24 = scalar_lea.vmem %s21_s16, 128  ;;  %p262_p4 = scmp.lt.s32.totalorder %s21_s16, %s21_s16 }
   0x8   :  { %p258_p3 = scmp.ne.s32.totalorder %s21_s16, %s257_s24  ;;  %p263_p5 = scmp.lt.s32.totalorder %s257_s24, %s257_s24 }
   0xa   :  { %p264_p6 = por %p263_p5, %p262_p4 }
   0xc   :  { %p265_p7 = pnand %p264_p6, %p258_p3 }
   0xe   :  { %268 = shalt.err (!%p265_p7)
}
   0xf   :  { %23 = dma.hbm_to_vmem [thread:$0]  %s344_s2, 128, %s21_s16, [#allocation8]  }
  0x10   :  { %269 = dma.done.wait [#allocation8], 128  }
  0x11   :  { %270 = vsyncadd [#allocation8], 4294967168  ;;  %vm33_vm0 = vcmask 7168   ;;  %v272_v0 = vmov 0.0|0.0   ;;  %v273_v1 = vmov 0.0   ;;  %vm274_vm1 = vmmov 0  }
  0x12   :  { %227 = vmatprep.subr.bf16.mxu0 %v272_v0  ;;  %35 = vst.msk [vmem:[#allocation3] sm:$0xff] %vm33_vm0, %v273_v1  ;;  %36 = vst.msk [vmem:[#allocation4] sm:$0xff] %vm33_vm0, %v273_v1  ;;  %224 = vmatprep.mubr.msk.f32.mxu0 %vm274_vm1, %v273_v1  ;;  %v275_v2 = vmov 0   ;;  %vm40_vm2 = vcmask 261120   ;;  %v38_v3 = vld [vmem:[#allocation7] sm:$0xff]  ;;  %v43_v4 = vld [vmem:[%s345_s3] sm:$0xff]  ;;  %v126_v18 = vlaneseq }
  0x13   :  { %37 = vst.msk [vmem:[#allocation5] sm:$0xff] %vm33_vm0, %v273_v1  ;;  %238 = vset.pattern.permute.xlu1 %v275_v2  ;;  %237 = vset.pattern.permute.xlu0 %v275_v2  ;;  %vm229_vm3 = vmpackc.low %vm40_vm2, %vm40_vm2  ;;  %v44_v5 = vld [vmem:[%s345_s3 + $0x8] sm:$0xff]  ;;  %v39_v6 = vmul.f32 2.0, %v38_v3  ;;  %v137_v8 = vld [vmem:[%s342_s0] sm:$0xff]  ;;  %v276_v10 = vmov -1e+30  }
  0x14   :  { %v228_v7 = vpack.c.bf16 %v44_v5, %v43_v4  ;;  %140 = vperm.xlu1 %238, %v137_v8   ;;  %34 = vst.msk [vmem:[#allocation2] sm:$0xff] %vm33_vm0, %v276_v10  ;;  %vm150_vm4 = vcmask 130048   ;;  %v127_v19 = vshrl.u32 %v126_v18, 7  ;;  %v132_v20 = vand.u32 127, %v126_v18  ;;  %v215_v26 = vld [vmem:[%s343_s1] ss:$0 sm:$0xff] }
  0x15   :  { %41 = vst.msk [vmem:[#allocation6] sm:$0xff] %vm40_vm2, %v39_v6 }
  0x16   :  { %230 = vmatpush3.bf16.xpose.msk.msra.mxu0 %vm229_vm3, %v228_v7  ;;  %v135_v21 = vmul.u32 2, %v127_v19 }
  0x18   :  { %vm136_vm5 = vcmp.ne.s32.totalorder %v132_v20, %v135_v21 }
  0x19   :  { %v168_v36 = vld [vmem:[#allocation3] sm:$0xff]  ;;  %v176_v43 = vld [vmem:[#allocation4] sm:$0xff] }
  0x1a   :  { %v183_v40 = vld [vmem:[#allocation5] sm:$0xff] }
  0x1b   :  { %v154_v14 = vld [vmem:[#allocation2] sm:$0xff] }
  0x1c   :  { %v42_v9 = vld [vmem:[#allocation6] sm:$0xff] }
  0x1d   :  { %225 = vmatmul.mubr.msk.f32.vlgmr.msra.gmra.mrb[0].mxu0 %vm40_vm2, %v42_v9 }
  0x93   :  { %v141_v27 = vpop.permute.xlu1 %140 }
  0x94   :  { %vm146_vm6 = vcmp.eq.s32.totalorder %v141_v27, %v215_v26 }
  0x95   :  { %vm147_vm7 = vmand %vm146_vm6, %vm136_vm5 }
  0x96   :  { %v216_v30 = vsel %vm147_vm7, 1.0, %v273_v1 }
  0x97   :  { %v184_v31 = vsel %vm150_vm4, %v216_v30, 0.0 }
  0xf0   :  { %v121_v11 = vpop.f32.mrb[0].mxu0 }
  0xf1   :  { %v226_v12 = vpop.f32.mrb[1].mxu0  ;;  %v151_v13 = vsel %vm150_vm4, %v121_v11, -inf  ;;  %v159_v22 = vsel %vm136_vm5, %v121_v11, -1e+30  ;;  %v177_v32 = vmul.f32 %v216_v30, %v121_v11 }
  0xf2   :  { %152 = vmax.xlane.f32.xlu0 %v151_v13 }
  0xf3   :  { %v178_v33 = vsel %vm150_vm4, %v177_v32, 0.0 }
 0x17f   :  { %v153_v15 = vpop.xlane.xlu0 %152 }
 0x180   :  { %v155_v16 = vmax.f32 %v154_v14, %v153_v15 }
 0x182   :  { %v156_v17 = vsub.f32 %v154_v14, %v155_v16  ;;  %189 = vst.msk [vmem:[#allocation2] sm:$0xff] %vm33_vm0, %v155_v16  ;;  %162 = vperm.xlu0 %237, %v155_v16  }
 0x184   :  { %v157_v34 = vmul.f32 1.442695, %v156_v17 }
 0x189   :  { %v199_v52 = vld [vmem:[#allocation2] sm:$0xff] }
 0x201   :  { %v163_v23 = vpop.permute.xlu0 %162 }
 0x202   :  { %v165_v24 = vsub.f32 %v159_v22, %v163_v23 }
 0x204   :  { %v166_v25 = vmul.f32 1.442695, %v165_v24 }
 0x206   :  { %239 = vpow2.f32 %v166_v25 }
 0x207   :  { %241 = vpow2.f32 %v157_v34 }
 0x210   :  { %v240_v28 = vpop.eup %239 }
 0x211   :  { %v170_v29 = vsel %vm150_vm4, %v240_v28, 0.0  ;;  %v242_v35 = vpop.eup %241 }
 0x212   :  { %171 = vadd.xlane.f32.xlu1 %v170_v29  ;;  %v169_v37 = vmul.f32 %v242_v35, %v168_v36 }
 0x216   :  { %185 = vadd.xlane.f32.xlu1 %v184_v31 }
 0x21a   :  { %179 = vadd.xlane.f32.xlu1 %v178_v33 }
 0x29f   :  { %v172_v38 = vpop.xlane.xlu1 %171 }
 0x2a0   :  { %v173_v39 = vadd.f32 %v172_v38, %v169_v37 }
 0x2a2   :  { %175 = vst.msk [vmem:[#allocation3] sm:$0xff] %vm33_vm0, %v173_v39 }
 0x2a3   :  { %v186_v41 = vpop.xlane.xlu1 %185 }
 0x2a4   :  { %v187_v42 = vadd.f32 %v186_v41, %v183_v40 }
 0x2a6   :  { %188 = vst.msk [vmem:[#allocation5] sm:$0xff] %vm33_vm0, %v187_v42 }
 0x2a7   :  { %v180_v44 = vpop.xlane.xlu1 %179 }
 0x2a8   :  { %v181_v45 = vadd.f32 %v180_v44, %v176_v43 }
 0x2a9   :  { %v194_v46 = vld [vmem:[#allocation3] sm:$0xff] }
 0x2aa   :  { %v195_v47 = vadd.f32 1e-06, %v194_v46  ;;  %182 = vst.msk [vmem:[#allocation4] sm:$0xff] %vm33_vm0, %v181_v45 }
 0x2ac   :  { %243 = vlog2.f32 %v195_v47 }
 0x2ad   :  { %v193_v48 = vld [vmem:[#allocation5] sm:$0xff] }
 0x2ae   :  { %v203_v49 = vadd.f32 1e-06, %v193_v48 }
 0x2b0   :  { %245 = vrcp.f32 %v203_v49 }
 0x2b1   :  { %v198_v56 = vld [vmem:[#allocation4] sm:$0xff] }
 0x2b6   :  { %v244_v50 = vpop.eup %243 }
 0x2b7   :  { %v197_v51 = vmul.f32 0.6931472, %v244_v50 }
 0x2b9   :  { %v200_v53 = vadd.f32 %v199_v52, %v197_v51 }
 0x2ba   :  { %v246_v55 = vpop.eup %245 }
 0x2bb   :  { %v201_v54 = vmul.f32 %v200_v53, %v193_v48 }
 0x2bd   :  { %v202_v57 = vsub.f32 %v198_v56, %v201_v54 }
 0x2bf   :  { %v205_v58 = vmul.f32 %v246_v55, %v202_v57 }
 0x2c1   :  { %206 = vst.msk [vmem:[%s346_s4] sm:$0xff] %vm33_vm0, %v205_v58 }
 0x2c2   :  { %211 = vsyncpa [#allocation8], 1 }

</bundles_post_ra>
